<compile_context>
chip_gen: v5e
topology: v5e:2x2
jax: 0.10.0
libtpu: 0.0.40
codegen_flags: <defaults>
</compile_context>

<pallas_src>
import jax
import jax.numpy as jnp
from jax.experimental import pallas as pl
from jax.experimental.pallas import tpu as pltpu

NEG_SLOPE = 0.01   # torch.nn.LeakyReLU default
BN_EPS = 1e-5      # torch.nn.BatchNorm2d default


def _leaky(v):
    return jnp.where(v > 0, v, NEG_SLOPE * v)


def residual_kernel(x_ref, top_ref, bot_ref, w1_ref, b1_ref, w2_ref, b2_ref,
                    o_ref, hpad_ref):
    # x_ref:    (1, TH, W, C)  f32   one H-tile of one batch element
    # top_ref:  (1, 1, W, C)   f32   row above the tile (zeros on image edge)
    # bot_ref:  (1, 1, W, C)   f32   row below the tile (zeros on image edge)
    # w1_ref:   (C, C2)        bf16  1x1 conv weight, BN1 scale folded in
    # b1_ref:   (1, C2)        f32   folded BN1 bias
    # w2_ref:   (9*C2, C)      bf16  3x3 conv weight (ky,kx,ci)-flattened, BN2 scale folded
    # b2_ref:   (1, C)         f32   folded BN2 bias
    # hpad_ref: (TH+2, W+2, C2) f32  zero-padded 1x1-conv output (scratch)
    _, TH, W, C = x_ref.shape
    C2 = w1_ref.shape[1]
    t = pl.program_id(1)
    nT = pl.num_programs(1)

    x = x_ref[0]                      # (TH, W, C) f32 (kept f32 for residual add)
    top = top_ref[0, 0]               # (W, C)
    bot = bot_ref[0, 0]               # (W, C)

    # ---- 1x1 conv (pointwise matmul, bf16 on MXU) + bias + LeakyReLU ----
    # Computed for the tile plus its two halo rows in a single matmul.
    xa = jnp.concatenate([top[None], x, bot[None]], axis=0)          # (TH+2, W, C)
    xa = xa.reshape((TH + 2) * W, C).astype(jnp.bfloat16)
    h1 = jnp.dot(xa, w1_ref[...], preferred_element_type=jnp.float32)
    h1 = _leaky(h1 + b1_ref[...])                                    # ((TH+2)*W, C2) f32

    # ---- fill the padded scratch (interior every step, borders cheaply) ----
    hpad_ref[:, 1:W + 1, :] = h1.reshape(TH + 2, W, C2)
    zero_col = jnp.zeros((TH + 2, 1, C2), hpad_ref.dtype)
    hpad_ref[:, 0:1, :] = zero_col                # left pad column
    hpad_ref[:, W + 1:W + 2, :] = zero_col        # right pad column

    zero_row = jnp.zeros((1, W + 2, C2), hpad_ref.dtype)

    @pl.when(t == 0)                              # top of the image: zero pad row
    def _():
        hpad_ref[0:1, :, :] = zero_row

    @pl.when(t == nT - 1)                         # bottom of the image: zero pad row
    def _():
        hpad_ref[TH + 1:TH + 2, :, :] = zero_row

    # ---- 3x3 conv, pad=1, stride=1: full im2col -> single wide-K MXU matmul ----
    taps = []
    for ky in range(3):
        for kx in range(3):
            taps.append(hpad_ref[ky:ky + TH, kx:kx + W, :])          # (TH, W, C2)
    patch = jnp.concatenate(taps, axis=-1)                           # (TH, W, 9*C2)
    patch = patch.reshape(TH * W, 9 * C2).astype(jnp.bfloat16)
    h2 = jnp.dot(patch, w2_ref[...], preferred_element_type=jnp.float32)  # (TH*W, C)
    h2 = _leaky(h2 + b2_ref[...])

    # ---- residual add (f32) ----
    out = x.reshape(TH * W, C) + h2
    o_ref[0] = out.reshape(TH, W, C).astype(o_ref.dtype)


def residual_layer_nhwc(x, w1, b1, w2f, b2, tile_h):
    """x: (N, H, W, C) f32; weights pre-folded (see residual_layer)."""
    N, H, W, C = x.shape
    C2 = w1.shape[1]
    assert H % tile_h == 0, "tile_h must divide H"
    TH = tile_h
    nT = H // TH

    # Halo rows for each tile: row above / row below (zeros at the image edges).
    zrow = jnp.zeros((N, 1, W, C), x.dtype)
    if nT > 1:
        above = x[:, TH - 1:H - 1:TH]                       # (N, nT-1, W, C)
        below = x[:, TH:H:TH]                               # (N, nT-1, W, C)
        top_halo = jnp.concatenate([zrow, above], axis=1)   # (N, nT, W, C)
        bot_halo = jnp.concatenate([below, zrow], axis=1)   # (N, nT, W, C)
    else:
        top_halo = zrow
        bot_halo = zrow

    # Explicit VMEM budget: double-buffered I/O blocks + scratch + weights + headroom.
    f32b = 4
    io_bytes = 2 * TH * W * C * f32b                 # x tile + out tile
    halo_bytes = 2 * W * C * f32b
    scratch_bytes = (TH + 2) * (W + 2) * C2 * f32b
    param_bytes = (C * C2 + 9 * C2 * C) * 2 + (C2 + C) * f32b
    need = 2 * (io_bytes + halo_bytes + param_bytes) + scratch_bytes
    vmem_limit = int(min(2 * need + (16 << 20), 64 << 20))

    return pl.pallas_call(
        residual_kernel,
        out_shape=jax.ShapeDtypeStruct((N, H, W, C), x.dtype),
        grid_spec=pltpu.PrefetchScalarGridSpec(
            num_scalar_prefetch=0,
            grid=(N, nT),
            in_specs=[
                pl.BlockSpec((1, TH, W, C), lambda n, t: (n, t, 0, 0)),
                pl.BlockSpec((1, 1, W, C), lambda n, t: (n, t, 0, 0)),
                pl.BlockSpec((1, 1, W, C), lambda n, t: (n, t, 0, 0)),
                pl.BlockSpec((C, C2), lambda n, t: (0, 0)),
                pl.BlockSpec((1, C2), lambda n, t: (0, 0)),
                pl.BlockSpec((9 * C2, C), lambda n, t: (0, 0)),
                pl.BlockSpec((1, C), lambda n, t: (0, 0)),
            ],
            out_specs=pl.BlockSpec((1, TH, W, C), lambda n, t: (n, t, 0, 0)),
            scratch_shapes=[pltpu.VMEM((TH + 2, W + 2, C2), jnp.float32)],
        ),
        compiler_params=pltpu.CompilerParams(
            dimension_semantics=("parallel", "parallel"),
            vmem_limit_bytes=vmem_limit),
    )(x, top_halo, bot_halo, w1, b1, w2f, b2)


def _fold_bn(gamma, beta, mean, var):
    scale = gamma / jnp.sqrt(var + BN_EPS)
    bias = beta - mean * scale
    return scale, bias


def residual_layer(x_nchw, conv1_w, bn1, conv2_w, bn2, tile_h=None):
    """PyTorch-layout entry point.

    x_nchw:  (N, C, H, W) f32
    conv1_w: (C2, C, 1, 1), conv2_w: (C, C2, 3, 3)  (PyTorch OIHW)
    bn1/bn2: (gamma, beta, running_mean, running_var) tuples.
    """
    N, C, H, W = x_nchw.shape
    C2 = conv1_w.shape[0]

    if tile_h is None:
        tile_h = H
        for d in range(min(H, 64), 0, -1):
            if H % d == 0:
                tile_h = d
                break

    # One-time host-side weight prep: fold BN scale into conv weights, bf16 cast.
    s1, b1 = _fold_bn(*bn1)
    s2, b2 = _fold_bn(*bn2)
    w1 = (conv1_w[:, :, 0, 0] * s1[:, None]).T.astype(jnp.bfloat16)        # (C, C2)
    w2 = jnp.transpose(conv2_w, (2, 3, 1, 0)) * s2[None, None, None, :]    # (3,3,C2,C)
    w2f = w2.reshape(9 * C2, C).astype(jnp.bfloat16)                       # (9*C2, C)
    b1 = b1.reshape(1, C2).astype(jnp.float32)
    b2 = b2.reshape(1, C).astype(jnp.float32)

    # TODO(synk): in a full network keep activations NHWC end-to-end instead of
    # transposing around every residual block (each transpose is a full HBM pass).
    x = jnp.transpose(x_nchw, (0, 2, 3, 1))
    out = residual_layer_nhwc(x, w1, b1, w2f, b2, tile_h)
    return jnp.transpose(out, (0, 3, 1, 2))


def _reference(x, conv1_w, bn1, conv2_w, bn2):
    """Pure-JAX NCHW f32 reference matching the PyTorch module (BN eval mode)."""
    def conv_bn_leaky(h, w, bn, padding):
        y = jax.lax.conv_general_dilated(
            h, w, window_strides=(1, 1), padding=padding,
            dimension_numbers=("NCHW", "OIHW", "NCHW"))
        scale, bias = _fold_bn(*bn)
        y = y * scale[None, :, None, None] + bias[None, :, None, None]
        return jnp.where(y > 0, y, NEG_SLOPE * y)

    h = conv_bn_leaky(x, conv1_w, bn1, "VALID")
    h = conv_bn_leaky(h, conv2_w, bn2, ((1, 1), (1, 1)))
    return x + h


if __name__ == "__main__":
    key = jax.random.PRNGKey(0)
    N, C, H, W = 2, 8, 16, 16          # in_channels = 8 -> mid channels = 4
    C2 = C // 2
    ks = jax.random.split(key, 11)

    x = jax.random.normal(ks[0], (N, C, H, W), jnp.float32)

    # Deterministic synthetic parameters (PyTorch shapes).
    conv1_w = 0.1 * jax.random.normal(ks[1], (C2, C, 1, 1), jnp.float32)   # (out,in,1,1)
    conv2_w = 0.1 * jax.random.normal(ks[2], (C, C2, 3, 3), jnp.float32)
    g1 = 1.0 + 0.1 * jax.random.normal(ks[3], (C2,), jnp.float32)
    be1 = 0.1 * jax.random.normal(ks[4], (C2,), jnp.float32)
    m1 = 0.1 * jax.random.normal(ks[5], (C2,), jnp.float32)
    v1 = 0.5 + jnp.abs(jax.random.normal(ks[6], (C2,), jnp.float32))
    g2 = 1.0 + 0.1 * jax.random.normal(ks[7], (C,), jnp.float32)
    be2 = 0.1 * jax.random.normal(ks[8], (C,), jnp.float32)
    m2 = 0.1 * jax.random.normal(ks[9], (C,), jnp.float32)
    v2 = 0.5 + jnp.abs(jax.random.normal(ks[10], (C,), jnp.float32))

    bn1 = (g1, be1, m1, v1)
    bn2 = (g2, be2, m2, v2)

    ref = _reference(x, conv1_w, bn1, conv2_w, bn2)

    # Exercise both the multi-tile (halo) path and the single-tile path.
    for th in (4, H):
        out = residual_layer(x, conv1_w, bn1, conv2_w, bn2, tile_h=th)
        out = jax.block_until_ready(out)
        assert out.shape == (N, C, H, W) and out.dtype == jnp.float32
        # bf16 MXU operands vs. f32 reference -> slightly loosened tolerance.
        assert jnp.allclose(out, ref, atol=2e-2, rtol=2e-2), \
            f"mismatch vs reference (tile_h={th})"

    print("KERNEL_OK")
</pallas_src>

<mosaic_0001>
module attributes {stable_mosaic.version = 11 : i64} {
  func.func @residual_kernel(%arg0: i32, %arg1: i32, %arg2: memref<1x4x16x8xf32, #tpu.memory_space<vmem>>, %arg3: memref<1x1x16x8xf32, #tpu.memory_space<vmem>>, %arg4: memref<1x1x16x8xf32, #tpu.memory_space<vmem>>, %arg5: memref<8x4xbf16, #tpu.memory_space<vmem>>, %arg6: memref<1x4xf32, #tpu.memory_space<vmem>>, %arg7: memref<36x8xbf16, #tpu.memory_space<vmem>>, %arg8: memref<1x8xf32, #tpu.memory_space<vmem>>, %arg9: memref<1x4x16x8xf32, #tpu.memory_space<vmem>>, %arg10: memref<6x18x4xf32, #tpu.memory_space<vmem>>) attributes {dimension_semantics = [#tpu.dimension_semantics<parallel>, #tpu.dimension_semantics<parallel>], iteration_bounds = array<i64: 2, 4>, scalar_prefetch = 0 : i64, scratch_operands = 1 : i64, tpu.core_type = #tpu.core_type<tc>, window_params = [{transform_indices = @transform_0, window_bounds = array<i64: 1, 4, 16, 8>}, {transform_indices = @transform_1, window_bounds = array<i64: 1, 1, 16, 8>}, {transform_indices = @transform_2, window_bounds = array<i64: 1, 1, 16, 8>}, {pipeline_mode = #tpu.pipeline_mode<synchronous>, transform_indices = @transform_3, window_bounds = array<i64: 8, 4>}, {pipeline_mode = #tpu.pipeline_mode<synchronous>, transform_indices = @transform_4, window_bounds = array<i64: 1, 4>}, {pipeline_mode = #tpu.pipeline_mode<synchronous>, transform_indices = @transform_5, window_bounds = array<i64: 36, 8>}, {pipeline_mode = #tpu.pipeline_mode<synchronous>, transform_indices = @transform_6, window_bounds = array<i64: 1, 8>}, {transform_indices = @transform_7, window_bounds = array<i64: 1, 4, 16, 8>}]} {
    %c0 = arith.constant 0 : index
    %c0_0 = arith.constant 0 : index
    %c0_1 = arith.constant 0 : index
    %c0_2 = arith.constant 0 : index
    %0 = vector.load %arg2[%c0, %c0_0, %c0_1, %c0_2] : memref<1x4x16x8xf32, #tpu.memory_space<vmem>>, vector<1x4x16x8xf32>
    %1 = vector.shape_cast %0 : vector<1x4x16x8xf32> to vector<4x16x8xf32>
    %c0_3 = arith.constant 0 : index
    %c0_4 = arith.constant 0 : index
    %c0_5 = arith.constant 0 : index
    %c0_6 = arith.constant 0 : index
    %2 = vector.load %arg3[%c0_3, %c0_4, %c0_5, %c0_6] : memref<1x1x16x8xf32, #tpu.memory_space<vmem>>, vector<1x1x16x8xf32>
    %3 = vector.shape_cast %2 : vector<1x1x16x8xf32> to vector<16x8xf32>
    %c0_7 = arith.constant 0 : index
    %c0_8 = arith.constant 0 : index
    %c0_9 = arith.constant 0 : index
    %c0_10 = arith.constant 0 : index
    %4 = vector.load %arg4[%c0_7, %c0_8, %c0_9, %c0_10] : memref<1x1x16x8xf32, #tpu.memory_space<vmem>>, vector<1x1x16x8xf32>
    %5 = vector.shape_cast %4 : vector<1x1x16x8xf32> to vector<16x8xf32>
    %6 = vector.shape_cast %3 : vector<16x8xf32> to vector<1x16x8xf32>
    %7 = vector.shape_cast %5 : vector<16x8xf32> to vector<1x16x8xf32>
    %8 = tpu.concatenate %6, %1, %7 in 0 : vector<1x16x8xf32>, vector<4x16x8xf32>, vector<1x16x8xf32> -> vector<6x16x8xf32>
    %9 = vector.shape_cast %8 : vector<6x16x8xf32> to vector<96x8xf32>
    %10 = arith.truncf %9 : vector<96x8xf32> to vector<96x8xbf16>
    %c0_11 = arith.constant 0 : index
    %c0_12 = arith.constant 0 : index
    %11 = vector.load %arg5[%c0_11, %c0_12] : memref<8x4xbf16, #tpu.memory_space<vmem>>, vector<8x4xbf16>
    %cst = arith.constant dense<0.000000e+00> : vector<96x4xf32>
    %12 = tpu.matmul %10, %11, %cst {dimension_numbers = #tpu.dot_dimension_numbers<[1], [0], [0], [1], [0, 0, 1, 1], [], []>} : vector<96x8xbf16>, vector<8x4xbf16>, vector<96x4xf32> -> vector<96x4xf32>
    %c0_13 = arith.constant 0 : index
    %c0_14 = arith.constant 0 : index
    %13 = vector.load %arg6[%c0_13, %c0_14] : memref<1x4xf32, #tpu.memory_space<vmem>>, vector<1x4xf32>
    %14 = vector.broadcast %13 : vector<1x4xf32> to vector<96x4xf32>
    %15 = arith.addf %12, %14 : vector<96x4xf32>
    %cst_15 = arith.constant 0.000000e+00 : f32
    %16 = vector.broadcast %cst_15 : f32 to vector<96x4xf32>
    %17 = arith.cmpf ogt, %15, %16 : vector<96x4xf32>
    %cst_16 = arith.constant 0.00999999977 : f32
    %18 = vector.broadcast %cst_16 : f32 to vector<96x4xf32>
    %19 = arith.mulf %18, %15 : vector<96x4xf32>
    %20 = arith.select %17, %15, %19 : vector<96x4xi1>, vector<96x4xf32>
    %21 = vector.shape_cast %20 : vector<96x4xf32> to vector<6x16x4xf32>
    %c0_17 = arith.constant 0 : index
    %c1 = arith.constant 1 : index
    %c0_18 = arith.constant 0 : index
    %22 = vector.load %arg10[%c0_17, %c1, %c0_18] : memref<6x18x4xf32, #tpu.memory_space<vmem>>, vector<6x16x4xf32>
    tpu.vector_store %arg10[%c0_17, %c1, %c0_18], %21 {strides = array<i32>} : memref<6x18x4xf32, #tpu.memory_space<vmem>>, vector<6x16x4xf32>,
    %cst_19 = arith.constant 0.000000e+00 : f32
    %23 = vector.broadcast %cst_19 : f32 to vector<6x1x4xf32>
    %c0_20 = arith.constant 0 : index
    %c0_21 = arith.constant 0 : index
    %c0_22 = arith.constant 0 : index
    %24 = vector.load %arg10[%c0_20, %c0_21, %c0_22] : memref<6x18x4xf32, #tpu.memory_space<vmem>>, vector<6x1x4xf32>
    tpu.vector_store %arg10[%c0_20, %c0_21, %c0_22], %23 {strides = array<i32>} : memref<6x18x4xf32, #tpu.memory_space<vmem>>, vector<6x1x4xf32>,
    %c0_23 = arith.constant 0 : index
    %c17 = arith.constant 17 : index
    %c0_24 = arith.constant 0 : index
    %25 = vector.load %arg10[%c0_23, %c17, %c0_24] : memref<6x18x4xf32, #tpu.memory_space<vmem>>, vector<6x1x4xf32>
    tpu.vector_store %arg10[%c0_23, %c17, %c0_24], %23 {strides = array<i32>} : memref<6x18x4xf32, #tpu.memory_space<vmem>>, vector<6x1x4xf32>,
    %cst_25 = arith.constant 0.000000e+00 : f32
    %26 = vector.broadcast %cst_25 : f32 to vector<1x18x4xf32>
    %c0_i32 = arith.constant 0 : i32
    %27 = arith.cmpi eq, %arg1, %c0_i32 : i32
    %28 = arith.extui %27 : i1 to i32
    %c0_i32_26 = arith.constant 0 : i32
    %29 = arith.cmpi ne, %28, %c0_i32_26 : i32
    scf.if %29 {
      %c0_65 = arith.constant 0 : index
      %c0_66 = arith.constant 0 : index
      %c0_67 = arith.constant 0 : index
      %61 = vector.load %arg10[%c0_65, %c0_66, %c0_67] : memref<6x18x4xf32, #tpu.memory_space<vmem>>, vector<1x18x4xf32>
      tpu.vector_store %arg10[%c0_65, %c0_66, %c0_67], %26 {strides = array<i32>} : memref<6x18x4xf32, #tpu.memory_space<vmem>>, vector<1x18x4xf32>,
    } else {
    }
    %c3_i32 = arith.constant 3 : i32
    %30 = arith.cmpi eq, %arg1, %c3_i32 : i32
    %31 = arith.extui %30 : i1 to i32
    %c0_i32_27 = arith.constant 0 : i32
    %32 = arith.cmpi ne, %31, %c0_i32_27 : i32
    scf.if %32 {
      %c5 = arith.constant 5 : index
      %c0_65 = arith.constant 0 : index
      %c0_66 = arith.constant 0 : index
      %61 = vector.load %arg10[%c5, %c0_65, %c0_66] : memref<6x18x4xf32, #tpu.memory_space<vmem>>, vector<1x18x4xf32>
      tpu.vector_store %arg10[%c5, %c0_65, %c0_66], %26 {strides = array<i32>} : memref<6x18x4xf32, #tpu.memory_space<vmem>>, vector<1x18x4xf32>,
    } else {
    }
    %c0_28 = arith.constant 0 : index
    %c0_29 = arith.constant 0 : index
    %c0_30 = arith.constant 0 : index
    %33 = vector.load %arg10[%c0_28, %c0_29, %c0_30] : memref<6x18x4xf32, #tpu.memory_space<vmem>>, vector<4x16x4xf32>
    %c0_31 = arith.constant 0 : index
    %c1_32 = arith.constant 1 : index
    %c0_33 = arith.constant 0 : index
    %34 = vector.load %arg10[%c0_31, %c1_32, %c0_33] : memref<6x18x4xf32, #tpu.memory_space<vmem>>, vector<4x16x4xf32>
    %c0_34 = arith.constant 0 : index
    %c2 = arith.constant 2 : index
    %c0_35 = arith.constant 0 : index
    %35 = vector.load %arg10[%c0_34, %c2, %c0_35] : memref<6x18x4xf32, #tpu.memory_space<vmem>>, vector<4x16x4xf32>
    %c1_36 = arith.constant 1 : index
    %c0_37 = arith.constant 0 : index
    %c0_38 = arith.constant 0 : index
    %36 = vector.load %arg10[%c1_36, %c0_37, %c0_38] : memref<6x18x4xf32, #tpu.memory_space<vmem>>, vector<4x16x4xf32>
    %c1_39 = arith.constant 1 : index
    %c1_40 = arith.constant 1 : index
    %c0_41 = arith.constant 0 : index
    %37 = vector.load %arg10[%c1_39, %c1_40, %c0_41] : memref<6x18x4xf32, #tpu.memory_space<vmem>>, vector<4x16x4xf32>
    %c1_42 = arith.constant 1 : index
    %c2_43 = arith.constant 2 : index
    %c0_44 = arith.constant 0 : index
    %38 = vector.load %arg10[%c1_42, %c2_43, %c0_44] : memref<6x18x4xf32, #tpu.memory_space<vmem>>, vector<4x16x4xf32>
    %c2_45 = arith.constant 2 : index
    %c0_46 = arith.constant 0 : index
    %c0_47 = arith.constant 0 : index
    %39 = vector.load %arg10[%c2_45, %c0_46, %c0_47] : memref<6x18x4xf32, #tpu.memory_space<vmem>>, vector<4x16x4xf32>
    %c2_48 = arith.constant 2 : index
    %c1_49 = arith.constant 1 : index
    %c0_50 = arith.constant 0 : index
    %40 = vector.load %arg10[%c2_48, %c1_49, %c0_50] : memref<6x18x4xf32, #tpu.memory_space<vmem>>, vector<4x16x4xf32>
    %c2_51 = arith.constant 2 : index
    %c2_52 = arith.constant 2 : index
    %c0_53 = arith.constant 0 : index
    %41 = vector.load %arg10[%c2_51, %c2_52, %c0_53] : memref<6x18x4xf32, #tpu.memory_space<vmem>>, vector<4x16x4xf32>
    %42 = tpu.concatenate %33, %34, %35, %36, %37, %38, %39, %40, %41 in 2 : vector<4x16x4xf32>, vector<4x16x4xf32>, vector<4x16x4xf32>, vector<4x16x4xf32>, vector<4x16x4xf32>, vector<4x16x4xf32>, vector<4x16x4xf32>, vector<4x16x4xf32>, vector<4x16x4xf32> -> vector<4x16x36xf32>
    %43 = vector.shape_cast %42 : vector<4x16x36xf32> to vector<64x36xf32>
    %44 = arith.truncf %43 : vector<64x36xf32> to vector<64x36xbf16>
    %c0_54 = arith.constant 0 : index
    %c0_55 = arith.constant 0 : index
    %45 = vector.load %arg7[%c0_54, %c0_55] : memref<36x8xbf16, #tpu.memory_space<vmem>>, vector<36x8xbf16>
    %cst_56 = arith.constant dense<0.000000e+00> : vector<64x8xf32>
    %46 = tpu.matmul %44, %45, %cst_56 {dimension_numbers = #tpu.dot_dimension_numbers<[1], [0], [0], [1], [0, 0, 1, 1], [], []>} : vector<64x36xbf16>, vector<36x8xbf16>, vector<64x8xf32> -> vector<64x8xf32>
    %c0_57 = arith.constant 0 : index
    %c0_58 = arith.constant 0 : index
    %47 = vector.load %arg8[%c0_57, %c0_58] : memref<1x8xf32, #tpu.memory_space<vmem>>, vector<1x8xf32>
    %48 = vector.broadcast %47 : vector<1x8xf32> to vector<64x8xf32>
    %49 = arith.addf %46, %48 : vector<64x8xf32>
    %cst_59 = arith.constant 0.000000e+00 : f32
    %50 = vector.broadcast %cst_59 : f32 to vector<64x8xf32>
    %51 = arith.cmpf ogt, %49, %50 : vector<64x8xf32>
    %cst_60 = arith.constant 0.00999999977 : f32
    %52 = vector.broadcast %cst_60 : f32 to vector<64x8xf32>
    %53 = arith.mulf %52, %49 : vector<64x8xf32>
    %54 = arith.select %51, %49, %53 : vector<64x8xi1>, vector<64x8xf32>
    %55 = vector.shape_cast %1 : vector<4x16x8xf32> to vector<64x8xf32>
    %56 = arith.addf %55, %54 : vector<64x8xf32>
    %57 = vector.shape_cast %56 : vector<64x8xf32> to vector<4x16x8xf32>
    %c0_61 = arith.constant 0 : index
    %c0_62 = arith.constant 0 : index
    %c0_63 = arith.constant 0 : index
    %c0_64 = arith.constant 0 : index
    %58 = vector.load %arg9[%c0_61, %c0_62, %c0_63, %c0_64] : memref<1x4x16x8xf32, #tpu.memory_space<vmem>>, vector<1x4x16x8xf32>
    %59 = vector.shape_cast %58 : vector<1x4x16x8xf32> to vector<4x16x8xf32>
    %60 = vector.shape_cast %57 : vector<4x16x8xf32> to vector<1x4x16x8xf32>
    tpu.vector_store %arg9[%c0_61, %c0_62, %c0_63, %c0_64], %60 {strides = array<i32>} : memref<1x4x16x8xf32, #tpu.memory_space<vmem>>, vector<1x4x16x8xf32>,
    return
  }
  func.func @transform_0(%arg0: i32, %arg1: i32) -> (i32, i32, i32, i32) {
    %c0_i32 = arith.constant 0 : i32
    %c0_i32_0 = arith.constant 0 : i32
    %c0_i32_1 = arith.constant 0 : i32
    return %arg0, %arg1, %c0_i32, %c0_i32_0 : i32, i32, i32, i32
  }
  func.func @transform_1(%arg0: i32, %arg1: i32) -> (i32, i32, i32, i32) {
    %c0_i32 = arith.constant 0 : i32
    %c0_i32_0 = arith.constant 0 : i32
    %c0_i32_1 = arith.constant 0 : i32
    return %arg0, %arg1, %c0_i32, %c0_i32_0 : i32, i32, i32, i32
  }
  func.func @transform_2(%arg0: i32, %arg1: i32) -> (i32, i32, i32, i32) {
    %c0_i32 = arith.constant 0 : i32
    %c0_i32_0 = arith.constant 0 : i32
    %c0_i32_1 = arith.constant 0 : i32
    return %arg0, %arg1, %c0_i32, %c0_i32_0 : i32, i32, i32, i32
  }
  func.func @transform_3(%arg0: i32, %arg1: i32) -> (i32, i32) {
    %c0_i32 = arith.constant 0 : i32
    %c0_i32_0 = arith.constant 0 : i32
    %c0_i32_1 = arith.constant 0 : i32
    return %c0_i32, %c0_i32_0 : i32, i32
  }
  func.func @transform_4(%arg0: i32, %arg1: i32) -> (i32, i32) {
    %c0_i32 = arith.constant 0 : i32
    %c0_i32_0 = arith.constant 0 : i32
    %c0_i32_1 = arith.constant 0 : i32
    return %c0_i32, %c0_i32_0 : i32, i32
  }
  func.func @transform_5(%arg0: i32, %arg1: i32) -> (i32, i32) {
    %c0_i32 = arith.constant 0 : i32
    %c0_i32_0 = arith.constant 0 : i32
    %c0_i32_1 = arith.constant 0 : i32
    return %c0_i32, %c0_i32_0 : i32, i32
  }
  func.func @transform_6(%arg0: i32, %arg1: i32) -> (i32, i32) {
    %c0_i32 = arith.constant 0 : i32
    %c0_i32_0 = arith.constant 0 : i32
    %c0_i32_1 = arith.constant 0 : i32
    return %c0_i32, %c0_i32_0 : i32, i32
  }
  func.func @transform_7(%arg0: i32, %arg1: i32) -> (i32, i32, i32, i32) {
    %c0_i32 = arith.constant 0 : i32
    %c0_i32_0 = arith.constant 0 : i32
    %c0_i32_1 = arith.constant 0 : i32
    return %arg0, %arg1, %c0_i32, %c0_i32_0 : i32, i32, i32, i32
  }
}

</mosaic_0001>

<bundles_post_ra>
// kernel: tpu_custom_call.1
= control target key start
LH: loop header
LB: loop body
LE: loop exit
PB: predicated region body
PF: predicated region fallthrough
CT: control target
= control target key end

     0   :  { %s1562_s24 = smov 0   ;;  %s1564_s25 = smov 0   ;;  %s1880_s0 = inlined_call_operand.vmem [shape: f32[2,16,16,8], index: 0, kind: input, shape index: {}]   ;;  %s1881_s1 = inlined_call_operand.vmem [shape: f32[2,4,16,8], index: 1, kind: input, shape index: {}]   ;;  %s1882_s2 = inlined_call_operand.vmem [shape: f32[2,4,16,8], index: 2, kind: input, shape index: {}]   ;;  %s1883_s3 = inlined_call_operand.vmem [shape: bf16[8,4], index: 3, kind: input, shape index: {}]   ;;  %s1884_s4 = inlined_call_operand.vmem [shape: f32[1,4], index: 4, kind: input, shape index: {}]   ;;  %s1885_s5 = inlined_call_operand.vmem [shape: bf16[36,8], index: 5, kind: input, shape index: {}]   ;;  %s1886_s6 = inlined_call_operand.vmem [shape: f32[1,8], index: 6, kind: input, shape index: {}]   ;;  %s1887_s7 = inlined_call_operand.vmem [shape: f32[2,16,16,8], index: 7, kind: output, shape index: {}]  }
   0x1   :  { %s1566_s26 = smov 0   ;;  %s1568_s27 = smov 0  }
   0x2   :  { %s1570_s28 = smov 0  }
   0x3 LB: > { %s26_s29 = sadd.s32 1, %s1501_s26  ;;  %s29_s30 = sadd.s32 1, %s1505_s27  ;;  %s1509_s28 = sphi %s1570_s28, %s17_s28   ;;  %s1505_s27 = sphi %s1568_s27, %s1891_s27   ;;  %s1501_s26 = sphi %s1566_s26, %s1890_s26   ;;  %s1497_s25 = sphi %s1564_s25, %s1889_s25   ;;  %s1493_s24 = sphi %s1562_s24, %s1888_s24  }
   0x4   : > { %p27_p0 = scmp.ge.s32.totalorder %s26_s29, 4  ;;  %p1215_p1 = scmp.ge.s32.totalorder %s1509_s28, 1 }
   0x5   : > { %p291_p2 = scmp.lt.s32.totalorder %s1509_s28, 9 }
   0x6   : > { %s1893_s29 = smov (%p27_p0, %s26_s29), 0  ;;  %s1895_s30 = smov (!%p27_p0, %s29_s30), %s1505_s27 }
   0x7   : > { %p292_p3 = pnand %p1215_p1, %p291_p2  ;;  %p31_p4 = scmp.ge.s32.totalorder %s1895_s30, 2 }
   0x8   : > { %s1216_s10 = sshll.u32 (!%p292_p3), %s1493_s24, 2  ;;  %p352_p5 = scmp.lt.s32.totalorder (!%p292_p3), %s1497_s25, 1 }
   0x9   : > { %s1897_s30 = smov (%p31_p4, %s1895_s30), 0  ;;  %295 = sbr.rel (%p292_p3) target bundleno = 564 (0x234), region = 48 }
   0xa   : > { %p354_p6 = scmp.lt.s32.totalorder (!%p292_p3), %s1216_s10, 15  ;;  %p364_p7 = scmp.lt.s32.totalorder (!%p292_p3), %s1493_s24, 3 }
   0xb   : > { %p1236_p8 = scmp.ne.s32.totalorder (!%p292_p3), %s1493_s24, 0 }
   0xe   : > { %v410_v0 = vld [vmem:[%s1883_s3] sm:$0xf]  ;;  %vm434_vm0 = vcmask 1043456   ;;  %s1899_s25 = smov (!%p352_p5, %s1497_s25), 1  ;;  %s1901_s10 = smov (!%p354_p6, %s1216_s10), 15  ;;  %vm415_vm1 = vcmask 64512  }
   0xf   : > { %v436_v1 = vsel %vm434_vm0, %v410_v0, 0  ;;  %s1218_s11 = sshll.u32 %s1899_s25, 5  ;;  %s1217_s12 = sshll.u32 %s1901_s10, 1  ;;  %v1647_v20 = vld [vmem:[%s1884_s4] ss:$0 sm:$0xff]  ;;  %vm513_vm2 = vcmask 31744  }
  0x10   : > { %445 = vmatpush.bf16.msra.mxu0 %v436_v1  ;;  %1254 = vmatpush.bf16.msra.mxu2 %v436_v1  ;;  %s358_s13 = sadd.s32 %s1218_s11, %s1217_s12  ;;  %s1221_s15 = sshll.u32 %s1899_s25, 3  ;;  %vm526_vm7 = vcmask 24576   ;;  %v1511_v39 = vmov 0.0  }
  0x11   : > { %s1219_s14 = sshll.u32 %s358_s13, 3  ;;  %527 = vst.msk [vmem:[#allocation2] sm:$0x1] %vm526_vm7, %v1511_v39 }
  0x12   : > { %s360_s18 = scalar_lea.vmem %s1880_s0, %s1219_s14  ;;  %s1605_s21 = scalar_lea.vmem %s1887_s7, %s1219_s14  ;;  %528 = vst.msk [vmem:[#allocation2 + $0x18] sm:$0x1] %vm526_vm7, %v1511_v39 }
  0x13   : > { %s365_s22 = scalar_select %p364_p7, %s1493_s24, 3  ;;  %v1608_v2 = vld [vmem:[%s360_s18 + $0x20] sm:$0xff]  ;;  %v1610_v3 = vld [vmem:[%s360_s18 + $0x28] sm:$0xff]  ;;  %v1619_v8 = vld [vmem:[%s360_s18 + $0x30] sm:$0xff]  ;;  %529 = vst.msk [vmem:[#allocation2 + $0x30] sm:$0x1] %vm526_vm7, %v1511_v39 }
  0x14   : > { %v407_v4 = vpack.c.bf16 %v1610_v3, %v1608_v2  ;;  %v1621_v9 = vld [vmem:[%s360_s18 + $0x38] sm:$0xff]  ;;  %v1625_v11 = vld [vmem:[%s360_s18] sm:$0xff]  ;;  %v1627_v12 = vld [vmem:[%s360_s18 + $0x8] sm:$0xff]  ;;  %530 = vst.msk [vmem:[#allocation2 + $0x48] sm:$0x1] %vm526_vm7, %v1511_v39 }
  0x15   : > { %s1220_s23 = sshll.u32 %s365_s22, 1  ;;  %v408_v10 = vpack.c.bf16 %v1621_v9, %v1619_v8  ;;  %v405_v13 = vpack.c.bf16 %v1627_v12, %v1625_v11  ;;  %v1636_v17 = vld [vmem:[%s360_s18 + $0x10] sm:$0xff]  ;;  %v1638_v18 = vld [vmem:[%s360_s18 + $0x18] sm:$0xff]  ;;  %531 = vst.msk [vmem:[#allocation2 + $0x60] sm:$0x1] %vm526_vm7, %v1511_v39 }
  0x16   : > { %s368_s25 = sadd.s32 %s1221_s15, %s1220_s23  ;;  %1233 = vmatmul.msk.bf16.vlgmr.msra.gmra.mxu2 %vm415_vm1, %v407_v4  ;;  %v406_v19 = vpack.c.bf16 %v1638_v18, %v1636_v17  ;;  %532 = vst.msk [vmem:[#allocation2 + $0x78] sm:$0x1] %vm526_vm7, %v1511_v39 }
  0x17   : > { %s1222_s8 = sshll.u32 %s368_s25, 3  ;;  %533 = vst.msk [vmem:[#allocation2 + $0x11] sm:$0x1] %vm526_vm7, %v1511_v39 }
  0x18   : > { %s370_s11 = scalar_lea.vmem %s1881_s1, %s1222_s8  ;;  %s379_s14 = scalar_lea.vmem %s1882_s2, %s1222_s8  ;;  %534 = vst.msk [vmem:[#allocation2 + $0x29] sm:$0x1] %vm526_vm7, %v1511_v39 }
  0x19   : > { %v400_v5 = vld [vmem:[%s370_s11] sm:$0xff]  ;;  %v401_v6 = vld [vmem:[%s370_s11 + $0x8] sm:$0xff]  ;;  %535 = vst.msk [vmem:[#allocation2 + $0x41] sm:$0x1] %vm526_vm7, %v1511_v39 }
  0x1a   : > { %v404_v7 = vpack.c.bf16 %v401_v6, %v400_v5  ;;  %v402_v14 = vld [vmem:[%s379_s14] sm:$0xff]  ;;  %v403_v15 = vld [vmem:[%s379_s14 + $0x8] sm:$0xff]  ;;  %536 = vst.msk [vmem:[#allocation2 + $0x59] sm:$0x1] %vm526_vm7, %v1511_v39 }
  0x1b   : > { %v409_v16 = vpack.c.bf16 %v403_v15, %v402_v14  ;;  %537 = vst.msk [vmem:[#allocation2 + $0x71] sm:$0x1] %vm526_vm7, %v1511_v39 }
  0x1c   : > { %1230 = vmatmul.msk.bf16.vlgmr.msra.gmra.mxu0 %vm415_vm1, %v404_v7  ;;  %538 = vst.msk [vmem:[#allocation2 + $0x89] sm:$0x1] %vm526_vm7, %v1511_v39 }
  0x26   : > { %1234 = vmatmul.msk.bf16.gmra.mxu2 %vm415_vm1, %v408_v10 }
  0x2c   : > { %1231 = vmatmul.msk.bf16.gmra.mxu0 %vm415_vm1, %v405_v13 }
  0x36   : > { %1235 = vmatmul.msk.bf16.gmra.mxu2 %vm415_vm1, %v409_v16 }
  0x3c   : > { %1232 = vmatmul.msk.bf16.gmra.mxu0 %vm415_vm1, %v406_v19 }
  0x99   : > { %v447_v21 = vpop.f32.mrf.mxu0  ;;  %v462_v22 = vpop.f32.mrf.mxu2 }
  0x9a   : > { %v448_v23 = vadd.f32 %v1647_v20, %v447_v21  ;;  %v463_v24 = vadd.f32 %v1647_v20, %v462_v22 }
  0x9c   : > { %vm477_vm3 = vcmp.gt.f32.partialorder %v448_v23, 0.0  ;;  %v489_v25 = vmul.f32 0.01, %v448_v23  ;;  %vm483_vm4 = vcmp.gt.f32.partialorder %v463_v24, 0.0  ;;  %v495_v26 = vmul.f32 0.01, %v463_v24 }
  0x9e   : > { %v501_v27 = vsel %vm477_vm3, %v448_v23, %v489_v25  ;;  %v507_v28 = vsel %vm483_vm4, %v463_v24, %v495_v26 }
  0x9f   : > { %514 = vst.msk [vmem:[#allocation2 + $0x1] sm:$0xff] %vm513_vm2, %v501_v27 }
  0xa0   : > { %520 = vst.msk [vmem:[#allocation2 + $0x49] sm:$0xff] %vm513_vm2, %v507_v28 }
  0xa1   : > { %v449_v29 = vpop.f32.mrf.mxu0  ;;  %v464_v30 = vpop.f32.mrf.mxu2 }
  0xa2   : > { %v450_v31 = vadd.f32 %v1647_v20, %v449_v29  ;;  %v465_v32 = vadd.f32 %v1647_v20, %v464_v30 }
  0xa4   : > { %vm478_vm5 = vcmp.gt.f32.partialorder %v450_v31, 0.0  ;;  %v490_v33 = vmul.f32 0.01, %v450_v31  ;;  %vm484_vm6 = vcmp.gt.f32.partialorder %v465_v32, 0.0  ;;  %v496_v34 = vmul.f32 0.01, %v465_v32 }
  0xa6   : > { %v502_v35 = vsel %vm478_vm5, %v450_v31, %v490_v33  ;;  %v508_v36 = vsel %vm484_vm6, %v465_v32, %v496_v34 }
  0xa7   : > { %515 = vst.msk [vmem:[#allocation2 + $0x9] sm:$0xff] %vm513_vm2, %v502_v35 }
  0xa8   : > { %521 = vst.msk [vmem:[#allocation2 + $0x51] sm:$0xff] %vm513_vm2, %v508_v36 }
  0xa9   : > { %v452_v37 = vpop.f32.mrf.mxu0  ;;  %v467_v38 = vpop.f32.mrf.mxu2 }
  0xaa   : > { %v453_v40 = vadd.f32 %v1647_v20, %v452_v37  ;;  %v468_v41 = vadd.f32 %v1647_v20, %v467_v38 }
  0xac   : > { %vm479_vm8 = vcmp.gt.f32.partialorder %v453_v40, 0.0  ;;  %v491_v42 = vmul.f32 0.01, %v453_v40  ;;  %vm485_vm9 = vcmp.gt.f32.partialorder %v468_v41, 0.0  ;;  %v497_v43 = vmul.f32 0.01, %v468_v41 }
  0xae   : > { %v503_v44 = vsel %vm479_vm8, %v453_v40, %v491_v42  ;;  %v509_v45 = vsel %vm485_vm9, %v468_v41, %v497_v43 }
  0xaf   : > { %516 = vst.msk [vmem:[#allocation2 + $0x19] sm:$0xff] %vm513_vm2, %v503_v44 }
  0xb0   : > { %522 = vst.msk [vmem:[#allocation2 + $0x61] sm:$0xff] %vm513_vm2, %v509_v45 }
  0xb1   : > { %v454_v46 = vpop.f32.mrf.mxu0  ;;  %v469_v47 = vpop.f32.mrf.mxu2 }
  0xb2   : > { %v455_v48 = vadd.f32 %v1647_v20, %v454_v46  ;;  %v470_v49 = vadd.f32 %v1647_v20, %v469_v47 }
  0xb4   : > { %vm480_vm10 = vcmp.gt.f32.partialorder %v455_v48, 0.0  ;;  %v492_v50 = vmul.f32 0.01, %v455_v48  ;;  %vm486_vm11 = vcmp.gt.f32.partialorder %v470_v49, 0.0  ;;  %v498_v51 = vmul.f32 0.01, %v470_v49 }
  0xb6   : > { %v504_v52 = vsel %vm480_vm10, %v455_v48, %v492_v50  ;;  %v510_v53 = vsel %vm486_vm11, %v470_v49, %v498_v51 }
  0xb7   : > { %517 = vst.msk [vmem:[#allocation2 + $0x21] sm:$0xff] %vm513_vm2, %v504_v52 }
  0xb8   : > { %523 = vst.msk [vmem:[#allocation2 + $0x69] sm:$0xff] %vm513_vm2, %v510_v53 }
  0xb9   : > { %v457_v54 = vpop.f32.mrf.mxu0  ;;  %v472_v55 = vpop.f32.mrf.mxu2 }
  0xba   : > { %v458_v56 = vadd.f32 %v1647_v20, %v457_v54  ;;  %v473_v57 = vadd.f32 %v1647_v20, %v472_v55 }
  0xbc   : > { %vm481_vm12 = vcmp.gt.f32.partialorder %v458_v56, 0.0  ;;  %v493_v58 = vmul.f32 0.01, %v458_v56  ;;  %vm487_vm13 = vcmp.gt.f32.partialorder %v473_v57, 0.0  ;;  %v499_v59 = vmul.f32 0.01, %v473_v57 }
  0xbe   : > { %v505_v60 = vsel %vm481_vm12, %v458_v56, %v493_v58  ;;  %v511_v61 = vsel %vm487_vm13, %v473_v57, %v499_v59 }
  0xbf   : > { %518 = vst.msk [vmem:[#allocation2 + $0x31] sm:$0xff] %vm513_vm2, %v505_v60 }
  0xc0   : > { %524 = vst.msk [vmem:[#allocation2 + $0x79] sm:$0xff] %vm513_vm2, %v511_v61 }
  0xc1   : > { %v459_v62 = vpop.f32.mrf.mxu0  ;;  %v474_v63 = vpop.f32.mrf.mxu2 }
  0xc2   : > { %v460_v0 = vadd.f32 %v1647_v20, %v459_v62  ;;  %v475_v1 = vadd.f32 %v1647_v20, %v474_v63 }
  0xc4   : > { %vm482_vm14 = vcmp.gt.f32.partialorder %v460_v0, 0.0  ;;  %v494_v4 = vmul.f32 0.01, %v460_v0  ;;  %vm488_vm15 = vcmp.gt.f32.partialorder %v475_v1, 0.0  ;;  %v500_v5 = vmul.f32 0.01, %v475_v1 }
  0xc5   : > { %542 = sbr.rel (%p1236_p8) target bundleno = 206 (0xce), region = 52 }
  0xc6   : > { %v506_v6 = vsel %vm482_vm14, %v460_v0, %v494_v4  ;;  %v512_v7 = vsel %vm488_vm15, %v475_v1, %v500_v5 }
  0xc7   : > { %519 = vst.msk [vmem:[#allocation2 + $0x39] sm:$0xff] %vm513_vm2, %v506_v6 }
  0xc8   : > { %525 = vst.msk [vmem:[#allocation2 + $0x81] sm:$0xff] %vm513_vm2, %v512_v7 }
  0xca   : > { %vm545_vm0 = vcmask 25600   ;;  %v1512_v10 = vmov 0.0  }
  0xcb   : > { %543 = vst.msk [vmem:[#allocation2] sm:$0xff] %vm513_vm2, %v1512_v10 }
  0xcc   : > { %544 = vst.msk [vmem:[#allocation2 + $0x8] sm:$0xff] %vm513_vm2, %v1512_v10 }
  0xcd   : > { %546 = vst.msk [vmem:[#allocation2 + $0x10] sm:$0x3] %vm545_vm0, %v1512_v10 }
  0xce PF: > { %p1237_p9 = scmp.ne.s32.totalorder %s1493_s24, 3 }
  0xd0   : > { %550 = sbr.rel (%p1237_p9) target bundleno = 217 (0xd9), region = 56 }
  0xd5   : > { %vm554_vm3 = vcmask 25600   ;;  %v1513_v13 = vmov 0.0  }
  0xd6   : > { %552 = vst.msk [vmem:[#allocation2 + $0x78] sm:$0xff] %vm513_vm2, %v1513_v13 }
  0xd7   : > { %553 = vst.msk [vmem:[#allocation2 + $0x80] sm:$0xff] %vm513_vm2, %v1513_v13 }
  0xd8   : > { %555 = vst.msk [vmem:[#allocation2 + $0x88] sm:$0x3] %vm554_vm3, %v1513_v13 }
  0xd9 PF: > { %v1691_v14 = vld [vmem:[#allocation2 + $0x30] sm:$0xff]  ;;  %v1693_v15 = vld [vmem:[#allocation2 + $0x38] sm:$0xff]  ;;  %v567_v20 = vld [vmem:[#allocation2 + $0x21] sm:$0xff]  ;;  %s1514_s24 = smov 12   ;;  %s1515_s17 = smov 4   ;;  %vm997_vm4 = vcmask 1041408  }
  0xda   : > { %v566_v16 = vld [vmem:[#allocation2 + $0x19] sm:$0xff]  ;;  %v1697_v19 = vpack.i.bf16 %v1693_v15, %v1691_v14  ;;  %v591_v22 = vld [vmem:[#allocation2 + $0x31] sm:$0xff]  ;;  %v575_v26 = vld [vmem:[#allocation2 + $0x22] sm:$0xff]  ;;  %s1516_s18 = smov 20   ;;  %s1517_s19 = smov 16   ;;  %vm902_vm5 = vcmask 97280  }
  0xdb   : > { %v1699_v21 = vpack.i.bf16 %v567_v20, %v566_v16  ;;  %v592_v23 = vld [vmem:[#allocation2 + $0x39] sm:$0xff]  ;;  %v1715_v31 = vld [vmem:[#allocation2 + $0x48] sm:$0xff]  ;;  %v1717_v32 = vld [vmem:[#allocation2 + $0x50] sm:$0xff]  ;;  %s1518_s20 = smov 8   ;;  %s1519_s22 = smov 24   ;;  %vm911_vm6 = vcmask 130048  }
  0xdc   : > { %1321 = vrot.lane.b32.xlu1 %v1697_v19, %s1514_s24  ;;  %v576_v24 = vld [vmem:[#allocation2 + $0x32] sm:$0xff]  ;;  %v574_v25 = vld [vmem:[#allocation2 + $0x1a] sm:$0xff]  ;;  %v1707_v29 = vpack.i.bf16 %v592_v23, %v591_v22  ;;  %v624_v33 = vld [vmem:[#allocation2 + $0x4a] sm:$0xff]  ;;  %v1360_v37 = vpack.i.bf16 %v1717_v32, %v1715_v31  ;;  %s1520_s23 = smov 32   ;;  %s1521_s25 = smov 28   ;;  %vm920_vm7 = vcmask 162816  }
  0xdd   : > { %1311 = vrot.lane.b32.xlu0 %v1699_v21, %s1515_s17  ;;  %v577_v27 = vld [vmem:[#allocation2 + $0x3a] sm:$0xff]  ;;  %v1709_v30 = vpack.i.bf16 %v575_v26, %v574_v25  ;;  %v625_v34 = vld [vmem:[#allocation2 + $0x52] sm:$0xff]  ;;  %v616_v35 = vld [vmem:[#allocation2 + $0x49] sm:$0xff]  ;;  %vm929_vm8 = vcmask 195584   ;;  %vm938_vm9 = vcmask 228352   ;;  %vm947_vm10 = vcmask 261120  }
  0xde   : > { %v1705_v28 = vpack.i.bf16 %v577_v27, %v576_v24  ;;  %v617_v36 = vld [vmem:[#allocation2 + $0x51] sm:$0xff]  ;;  %v1345_v38 = vpack.i.bf16 %v625_v34, %v624_v33  ;;  %v610_v40 = vld [vmem:[#allocation2 + $0x60] sm:$0xff]  ;;  %v611_v41 = vld [vmem:[#allocation2 + $0x68] sm:$0xff]  ;;  %vm984_vm11 = vcmask 293888  }
  0xdf   : > { %v1340_v39 = vpack.i.bf16 %v617_v36, %v616_v35  ;;  %v1375_v42 = vpack.i.bf16 %v611_v41, %v610_v40  ;;  %v595_v43 = vld [vmem:[#allocation2 + $0x61] sm:$0xff]  ;;  %v596_v44 = vld [vmem:[#allocation2 + $0x69] sm:$0xff]  ;;  %v612_v51 = vld [vmem:[#allocation2 + $0x78] sm:$0xff] }
  0xe0   : > { %1331 = vrot.lane.b32.xlu2 %v1705_v28, %s1516_s18  ;;  %v626_v45 = vld [vmem:[#allocation2 + $0x62] sm:$0xff]  ;;  %v627_v46 = vld [vmem:[#allocation2 + $0x6a] sm:$0xff]  ;;  %v1405_v47 = vpack.i.bf16 %v596_v44, %v595_v43  ;;  %v620_v55 = vld [vmem:[#allocation2 + $0x79] sm:$0xff] }
  0xe1   : > { %v1385_v48 = vpack.i.bf16 %v627_v46, %v626_v45  ;;  %v564_v49 = vld [vmem:[#allocation2 + $0x1] sm:$0xff]  ;;  %v565_v50 = vld [vmem:[#allocation2 + $0x9] sm:$0xff]  ;;  %v581_v0 = vld [vmem:[#allocation2 + $0x18] sm:$0xff] }
  0xe2   : > { %v613_v52 = vld [vmem:[#allocation2 + $0x80] sm:$0xff]  ;;  %v1420_v53 = vpack.i.bf16 %v565_v50, %v564_v49  ;;  %v573_v61 = vld [vmem:[#allocation2 + $0xa] sm:$0xff] }
  0xe3   : > { %v1415_v54 = vpack.i.bf16 %v613_v52, %v612_v51  ;;  %v621_v56 = vld [vmem:[#allocation2 + $0x81] sm:$0xff]  ;;  %v964_v5 = vld [vmem:[%s1885_s5 + $0x10] sm:$0x3] }
  0xe4   : > { %1326 = vrot.lane.b32.xlu1 %v1707_v29, %s1517_s19  ;;  %v628_v57 = vld [vmem:[#allocation2 + $0x7a] sm:$0xff]  ;;  %v629_v58 = vld [vmem:[#allocation2 + $0x82] sm:$0xff]  ;;  %v1425_v59 = vpack.i.bf16 %v621_v56, %v620_v55  ;;  %v978_v6 = vunpack.c.l.b16 %v964_v5 }
  0xe5   : > { %1316 = vrot.lane.b32.xlu0 %v1709_v30, %s1518_s20  ;;  %v572_v60 = vld [vmem:[#allocation2 + $0x2] sm:$0xff]  ;;  %v1435_v62 = vpack.i.bf16 %v629_v58, %v628_v57 }
  0xe6   : > { %v1430_v63 = vpack.i.bf16 %v573_v61, %v572_v60  ;;  %v582_v1 = vld [vmem:[#allocation2 + $0x20] sm:$0xff]  ;;  %v981_v7 = vpack.c.b16 %v978_v6, %v978_v6  ;;  %v1253_v16 = vld [vmem:[%s1885_s5 + $0x8] sm:$0xff] }
  0xe7   : > { %v1440_v4 = vpack.i.bf16 %v582_v1, %v581_v0 }
  0xe8   : > { %1336 = vrot.lane.b32.xlu2 %v1360_v37, %s1519_s22  ;;  %v999_v10 = vsel %vm997_vm4, %v981_v7, 0 }
  0xe9   : > { %1255 = vmatpush.bf16.msra.mxu3 %v999_v10  ;;  %1006 = vmatpush.bf16.msra.mxu1 %v999_v10 }
  0xec   : > { %1346 = vrot.lane.b32.xlu1 %v1345_v38, %s1520_s23 }
  0xed   : > { %1341 = vrot.lane.b32.xlu0 %v1340_v39, %s1521_s25  ;;  %1256 = vmatpush.bf16.msra.mxu3 %v1253_v16 }
  0xee   : > { %1007 = vmatpush.bf16.msra.mxu1 %v1253_v16 }
  0xf0   : > { %1351 = vrot.lane.b32.xlu2 %v1707_v29, %s1515_s17 }
  0xf4   : > { %1361 = vrot.lane.b32.xlu1 %v1360_v37, %s1514_s24 }
  0xf5   : > { %1356 = vrot.lane.b32.xlu0 %v1705_v28, %s1518_s20 }
  0xf8   : > { %1366 = vrot.lane.b32.xlu2 %v1340_v39, %s1517_s19 }
  0xfc   : > { %1376 = vrot.lane.b32.xlu1 %v1375_v42, %s1519_s22 }
  0xfd   : > { %1371 = vrot.lane.b32.xlu0 %v1345_v38, %s1516_s18 }
 0x100   : > { %1381 = vrot.lane.b32.xlu2 %v1405_v47, %s1521_s25 }
 0x104   : > { %1391 = vrot.lane.b32.xlu1 %v1340_v39, %s1515_s17 }
 0x105   : > { %1386 = vrot.lane.b32.xlu0 %v1385_v48, %s1520_s23 }
 0x108   : > { %1396 = vrot.lane.b32.xlu2 %v1345_v38, %s1518_s20 }
 0x10c   : > { %1406 = vrot.lane.b32.xlu1 %v1405_v47, %s1517_s19 }
 0x10d   : > { %1401 = vrot.lane.b32.xlu0 %v1375_v42, %s1514_s24 }
 0x110   : > { %1411 = vrot.lane.b32.xlu2 %v1385_v48, %s1516_s18 }
 0x114   : > { %1421 = vrot.lane.b32.xlu1 %v1420_v53, %s1515_s17 }
 0x115   : > { %1416 = vrot.lane.b32.xlu0 %v1415_v54, %s1519_s22 }
 0x118   : > { %1426 = vrot.lane.b32.xlu2 %v1425_v59, %s1521_s25 }
 0x11c   : > { %1436 = vrot.lane.b32.xlu1 %v1435_v62, %s1520_s23 }
 0x11d   : > { %1431 = vrot.lane.b32.xlu0 %v1430_v63, %s1518_s20 }
 0x120   : > { %1441 = vrot.lane.b32.xlu2 %v1440_v4, %s1514_s24 }
 0x124   : > { %1451 = vrot.lane.b32.xlu1 %v1709_v30, %s1516_s18 }
 0x125   : > { %1446 = vrot.lane.b32.xlu0 %v1699_v21, %s1517_s19 }
 0x128   : > { %1456 = vrot.lane.b32.xlu2 %v1697_v19, %s1519_s22  ;;  %v1252_v19 = vld [vmem:[%s1885_s5] sm:$0xff] }
 0x129   : > { %1257 = vmatpush.bf16.msra.mxu3 %v1252_v19  ;;  %1008 = vmatpush.bf16.msra.mxu1 %v1252_v19 }
 0x12c   : > { %1466 = vrot.lane.b32.xlu1 %v1705_v28, %s1520_s23 }
 0x12d   : > { %1461 = vrot.lane.b32.xlu0 %v1707_v29, %s1521_s25 }
 0x13a   : > { %v1332_v13 = vpop.permute.xlu2 %1331 }
 0x13b   : > { %v1334_v43 = vunpack.i.h.bf16 %v1332_v13  ;;  %v1333_v44 = vunpack.i.l.bf16 %v1332_v13 }
 0x142   : > { %v1337_v20 = vpop.permute.xlu2 %1336 }
 0x143   : > { %v1339_v47 = vunpack.i.h.bf16 %v1337_v20  ;;  %v1338_v48 = vunpack.i.l.bf16 %v1337_v20 }
 0x14a   : > { %v1352_v23 = vpop.permute.xlu2 %1351 }
 0x14b   : > { %v1353_v4 = vunpack.i.l.bf16 %v1352_v23 }
 0x14d   : > { %v890_v13 = vsel %vm513_vm2, %v1691_v14, %v1353_v4 }
 0x14e   : > { %v1322_v21 = vpop.permute.xlu1 %1321 }
 0x14f   : > { %v1312_v22 = vpop.permute.xlu0 %1311  ;;  %v1324_v34 = vunpack.i.h.bf16 %v1322_v21  ;;  %v1323_v35 = vunpack.i.l.bf16 %v1322_v21 }
 0x150   : > { %v1314_v24 = vunpack.i.h.bf16 %v1312_v22  ;;  %v1313_v25 = vunpack.i.l.bf16 %v1312_v22 }
 0x152   : > { %v888_v36 = vsel %vm513_vm2, %v581_v0, %v1313_v25  ;;  %v889_v37 = vsel %vm513_vm2, %v582_v1, %v1314_v24  ;;  %v1367_v38 = vpop.permute.xlu2 %1366  ;;  %v1354_v1 = vunpack.i.h.bf16 %v1352_v23 }
 0x153   : > { %v1369_v23 = vunpack.i.h.bf16 %v1367_v38  ;;  %v1368_v25 = vunpack.i.l.bf16 %v1367_v38 }
 0x154   : > { %v891_v16 = vsel %vm513_vm2, %v1693_v15, %v1354_v1 }
 0x156   : > { %v1327_v26 = vpop.permute.xlu1 %1326 }
 0x157   : > { %v1317_v27 = vpop.permute.xlu0 %1316  ;;  %v1329_v28 = vunpack.i.h.bf16 %v1327_v26  ;;  %v1328_v29 = vunpack.i.l.bf16 %v1327_v26 }
 0x158   : > { %v1319_v30 = vunpack.i.h.bf16 %v1317_v27  ;;  %v1318_v33 = vunpack.i.l.bf16 %v1317_v27 }
 0x15a   : > { %v896_v39 = vsel %vm415_vm1, %v888_v36, %v1318_v33  ;;  %v897_v40 = vsel %vm415_vm1, %v889_v37, %v1319_v30  ;;  %v1382_v63 = vpop.permute.xlu2 %1381 }
 0x15b   : > { %v905_v41 = vsel %vm902_vm5, %v896_v39, %v1323_v35  ;;  %v906_v42 = vsel %vm902_vm5, %v897_v40, %v1324_v34  ;;  %v1384_v39 = vunpack.i.h.bf16 %v1382_v63  ;;  %v1383_v38 = vunpack.i.l.bf16 %v1382_v63 }
 0x15c   : > { %v914_v45 = vsel %vm911_vm6, %v905_v41, %v1328_v29  ;;  %v915_v46 = vsel %vm911_vm6, %v906_v42, %v1329_v28 }
 0x15d   : > { %v923_v49 = vsel %vm920_vm7, %v914_v45, %v1333_v44  ;;  %v924_v50 = vsel %vm920_vm7, %v915_v46, %v1334_v43 }
 0x15e   : > { %v1347_v51 = vpop.permute.xlu1 %1346  ;;  %v932_v57 = vsel %vm929_vm8, %v923_v49, %v1338_v48  ;;  %v933_v58 = vsel %vm929_vm8, %v924_v50, %v1339_v47 }
 0x15f   : > { %v1349_v52 = vunpack.i.h.bf16 %v1347_v51  ;;  %v1348_v53 = vunpack.i.l.bf16 %v1347_v51  ;;  %v1342_v54 = vpop.permute.xlu0 %1341 }
 0x160   : > { %v1344_v55 = vunpack.i.h.bf16 %v1342_v54  ;;  %v1343_v56 = vunpack.i.l.bf16 %v1342_v54 }
 0x162   : > { %v941_v59 = vsel %vm938_vm9, %v932_v57, %v1343_v56  ;;  %v942_v60 = vsel %vm938_vm9, %v933_v58, %v1344_v55  ;;  %v1397_v24 = vpop.permute.xlu2 %1396 }
 0x163   : > { %v950_v61 = vsel %vm947_vm10, %v941_v59, %v1348_v53  ;;  %v951_v62 = vsel %vm947_vm10, %v942_v60, %v1349_v52  ;;  %v1399_v56 = vunpack.i.h.bf16 %v1397_v24  ;;  %v1398_v57 = vunpack.i.l.bf16 %v1397_v24 }
 0x164   : > { %v957_v0 = vpack.c.bf16 %v951_v62, %v950_v61 }
 0x166   : > { %1247 = vmatmul.msk.bf16.vlgmr.msra.gmra.mxu3 %vm984_vm11, %v957_v0  ;;  %v1362_v5 = vpop.permute.xlu1 %1361 }
 0x167   : > { %v1357_v6 = vpop.permute.xlu0 %1356  ;;  %v1364_v19 = vunpack.i.h.bf16 %v1362_v5  ;;  %v1363_v20 = vunpack.i.l.bf16 %v1362_v5 }
 0x168   : > { %v1359_v7 = vunpack.i.h.bf16 %v1357_v6  ;;  %v1358_v10 = vunpack.i.l.bf16 %v1357_v6 }
 0x16a   : > { %v898_v21 = vsel %vm415_vm1, %v890_v13, %v1358_v10  ;;  %v899_v22 = vsel %vm415_vm1, %v891_v16, %v1359_v7  ;;  %v1412_v44 = vpop.permute.xlu2 %1411 }
 0x16b   : > { %v907_v27 = vsel %vm902_vm5, %v898_v21, %v1363_v20  ;;  %v908_v28 = vsel %vm902_vm5, %v899_v22, %v1364_v19  ;;  %v1414_v13 = vunpack.i.h.bf16 %v1412_v44  ;;  %v1413_v16 = vunpack.i.l.bf16 %v1412_v44 }
 0x16c   : > { %v916_v33 = vsel %vm911_vm6, %v907_v27, %v1368_v25  ;;  %v917_v15 = vsel %vm911_vm6, %v908_v28, %v1369_v23 }
 0x16e   : > { %v1377_v26 = vpop.permute.xlu1 %1376 }
 0x16f   : > { %v1372_v29 = vpop.permute.xlu0 %1371  ;;  %v1379_v34 = vunpack.i.h.bf16 %v1377_v26  ;;  %v1378_v35 = vunpack.i.l.bf16 %v1377_v26 }
 0x170   : > { %v1374_v30 = vunpack.i.h.bf16 %v1372_v29  ;;  %v1373_v14 = vunpack.i.l.bf16 %v1372_v29 }
 0x172   : > { %v925_v36 = vsel %vm920_vm7, %v916_v33, %v1373_v14  ;;  %v926_v37 = vsel %vm920_vm7, %v917_v15, %v1374_v30  ;;  %v1427_v58 = vpop.permute.xlu2 %1426 }
 0x173   : > { %v934_v40 = vsel %vm929_vm8, %v925_v36, %v1378_v35  ;;  %v935_v41 = vsel %vm929_vm8, %v926_v37, %v1379_v34  ;;  %v1429_v23 = vunpack.i.h.bf16 %v1427_v58  ;;  %v1428_v25 = vunpack.i.l.bf16 %v1427_v58 }
 0x174   : > { %v943_v47 = vsel %vm938_vm9, %v934_v40, %v1383_v38  ;;  %v944_v48 = vsel %vm938_vm9, %v935_v41, %v1384_v39  ;;  %v556_v39 = vld [vmem:[#allocation2] sm:$0xff]  ;;  %v557_v38 = vld [vmem:[#allocation2 + $0x8] sm:$0xff] }
 0x176   : > { %v1392_v42 = vpop.permute.xlu1 %1391 }
 0x177   : > { %v1387_v43 = vpop.permute.xlu0 %1386  ;;  %v1394_v52 = vunpack.i.h.bf16 %v1392_v42  ;;  %v1393_v53 = vunpack.i.l.bf16 %v1392_v42 }
 0x178   : > { %v1389_v45 = vunpack.i.h.bf16 %v1387_v43  ;;  %v1388_v46 = vunpack.i.l.bf16 %v1387_v43 }
 0x179   : > { %v892_v59 = vsel %vm513_vm2, %v1715_v31, %v1393_v53  ;;  %v893_v60 = vsel %vm513_vm2, %v1717_v32, %v1394_v52 }
 0x17a   : > { %v952_v49 = vsel %vm947_vm10, %v943_v47, %v1388_v46  ;;  %v953_v50 = vsel %vm947_vm10, %v944_v48, %v1389_v45  ;;  %v900_v63 = vsel %vm415_vm1, %v892_v59, %v1398_v57  ;;  %v901_v0 = vsel %vm415_vm1, %v893_v60, %v1399_v56  ;;  %v1442_v21 = vpop.permute.xlu2 %1441 }
 0x17b   : > { %v958_v51 = vpack.c.bf16 %v953_v50, %v952_v49  ;;  %v1444_v45 = vunpack.i.h.bf16 %v1442_v21  ;;  %v1443_v46 = vunpack.i.l.bf16 %v1442_v21  ;;  %v1470_v21 = vld [vmem:[%s1886_s6] ss:$0 sm:$0xff] }
 0x17d   : > { %1248 = vmatmul.msk.bf16.gmra.mxu3 %vm984_vm11, %v958_v51 }
 0x17e   : > { %v1407_v54 = vpop.permute.xlu1 %1406 }
 0x17f   : > { %v1402_v55 = vpop.permute.xlu0 %1401  ;;  %v1409_v1 = vunpack.i.h.bf16 %v1407_v54  ;;  %v1408_v4 = vunpack.i.l.bf16 %v1407_v54 }
 0x180   : > { %v1404_v61 = vunpack.i.h.bf16 %v1402_v55  ;;  %v1403_v62 = vunpack.i.l.bf16 %v1402_v55 }
 0x182   : > { %v909_v5 = vsel %vm902_vm5, %v900_v63, %v1403_v62  ;;  %v910_v6 = vsel %vm902_vm5, %v901_v0, %v1404_v61  ;;  %v1457_v47 = vpop.permute.xlu2 %1456 }
 0x183   : > { %v918_v31 = vsel %vm911_vm6, %v909_v5, %v1408_v4  ;;  %v919_v32 = vsel %vm911_vm6, %v910_v6, %v1409_v1  ;;  %v1459_v56 = vunpack.i.h.bf16 %v1457_v47  ;;  %v1458_v57 = vunpack.i.l.bf16 %v1457_v47 }
 0x184   : > { %v927_v22 = vsel %vm920_vm7, %v918_v31, %v1413_v16  ;;  %v928_v24 = vsel %vm920_vm7, %v919_v32, %v1414_v13 }
 0x186   : > { %v1422_v7 = vpop.permute.xlu1 %1421 }
 0x187   : > { %v1417_v10 = vpop.permute.xlu0 %1416  ;;  %v1424_v34 = vunpack.i.h.bf16 %v1422_v7  ;;  %v1423_v35 = vunpack.i.l.bf16 %v1422_v7 }
 0x188   : > { %v1419_v19 = vunpack.i.h.bf16 %v1417_v10  ;;  %v1418_v20 = vunpack.i.l.bf16 %v1417_v10 }
 0x189   : > { %v886_v43 = vsel %vm513_vm2, %v556_v39, %v1423_v35  ;;  %v887_v44 = vsel %vm513_vm2, %v557_v38, %v1424_v34 }
 0x18a   : > { %v936_v26 = vsel %vm929_vm8, %v927_v22, %v1418_v20  ;;  %v937_v27 = vsel %vm929_vm8, %v928_v24, %v1419_v19 }
 0x18b   : > { %v945_v33 = vsel %vm938_vm9, %v936_v26, %v1428_v25  ;;  %v946_v15 = vsel %vm938_vm9, %v937_v27, %v1429_v23 }
 0x18e   : > { %v1437_v28 = vpop.permute.xlu1 %1436 }
 0x18f   : > { %v1432_v29 = vpop.permute.xlu0 %1431  ;;  %v1439_v30 = vunpack.i.h.bf16 %v1437_v28  ;;  %v1438_v14 = vunpack.i.l.bf16 %v1437_v28 }
 0x190   : > { %v1434_v40 = vunpack.i.h.bf16 %v1432_v29  ;;  %v1433_v41 = vunpack.i.l.bf16 %v1432_v29 }
 0x191   : > { %v954_v36 = vsel %vm947_vm10, %v945_v33, %v1438_v14  ;;  %v955_v37 = vsel %vm947_vm10, %v946_v15, %v1439_v30 }
 0x192   : > { %v959_v42 = vpack.c.bf16 %v955_v37, %v954_v36  ;;  %v894_v48 = vsel %vm415_vm1, %v886_v43, %v1433_v41  ;;  %v895_v49 = vsel %vm415_vm1, %v887_v44, %v1434_v40 }
 0x193   : > { %v903_v58 = vsel %vm902_vm5, %v894_v48, %v1443_v46  ;;  %v904_v59 = vsel %vm902_vm5, %v895_v49, %v1444_v45 }
 0x194   : > { %1249 = vmatmul.msk.bf16.gmra.mxu3 %vm984_vm11, %v959_v42 }
 0x196   : > { %v1452_v50 = vpop.permute.xlu1 %1451 }
 0x197   : > { %v1447_v51 = vpop.permute.xlu0 %1446  ;;  %v1454_v52 = vunpack.i.h.bf16 %v1452_v50  ;;  %v1453_v53 = vunpack.i.l.bf16 %v1452_v50 }
 0x198   : > { %v1449_v54 = vunpack.i.h.bf16 %v1447_v51  ;;  %v1448_v55 = vunpack.i.l.bf16 %v1447_v51 }
 0x19a   : > { %v912_v60 = vsel %vm911_vm6, %v903_v58, %v1448_v55  ;;  %v913_v61 = vsel %vm911_vm6, %v904_v59, %v1449_v54 }
 0x19b   : > { %v921_v62 = vsel %vm920_vm7, %v912_v60, %v1453_v53  ;;  %v922_v63 = vsel %vm920_vm7, %v913_v61, %v1454_v52 }
 0x19c   : > { %v930_v0 = vsel %vm929_vm8, %v921_v62, %v1458_v57  ;;  %v931_v1 = vsel %vm929_vm8, %v922_v63, %v1459_v56 }
 0x19e   : > { %v1467_v4 = vpop.permute.xlu1 %1466 }
 0x19f   : > { %v1462_v5 = vpop.permute.xlu0 %1461  ;;  %v1469_v6 = vunpack.i.h.bf16 %v1467_v4  ;;  %v1468_v7 = vunpack.i.l.bf16 %v1467_v4 }
 0x1a0   : > { %v1464_v10 = vunpack.i.h.bf16 %v1462_v5  ;;  %v1463_v13 = vunpack.i.l.bf16 %v1462_v5 }
 0x1a2   : > { %v939_v16 = vsel %vm938_vm9, %v930_v0, %v1463_v13  ;;  %v940_v31 = vsel %vm938_vm9, %v931_v1, %v1464_v10 }
 0x1a3   : > { %v948_v32 = vsel %vm947_vm10, %v939_v16, %v1468_v7  ;;  %v949_v19 = vsel %vm947_vm10, %v940_v31, %v1469_v6 }
 0x1a4   : > { %v956_v20 = vpack.c.bf16 %v949_v19, %v948_v32 }
 0x1a6   : > { %1246 = vmatmul.msk.bf16.vlgmr.msra.gmra.mxu1 %vm984_vm11, %v956_v20 }
 0x1e9   : > { %v1015_v22 = vpop.f32.mrf.mxu3 }
 0x1ea   : > { %v1016_v24 = vadd.f32 %v1470_v21, %v1015_v22 }
 0x1ec   : > { %vm1032_vm2 = vcmp.gt.f32.partialorder %v1016_v24, 0.0  ;;  %v1040_v23 = vmul.f32 0.01, %v1016_v24 }
 0x1ee   : > { %v1048_v25 = vsel %vm1032_vm2, %v1016_v24, %v1040_v23 }
 0x1ef   : > { %v1056_v26 = vadd.f32 %v1048_v25, %v1636_v17 }
 0x1f1   : > { %1064 = vst.msk [vmem:[%s1605_s21 + $0x10] sm:$0xff] %vm415_vm1, %v1056_v26  ;;  %v1017_v27 = vpop.f32.mrf.mxu3 }
 0x1f2   : > { %v1018_v28 = vadd.f32 %v1470_v21, %v1017_v27 }
 0x1f4   : > { %vm1033_vm12 = vcmp.gt.f32.partialorder %v1018_v28, 0.0  ;;  %v1041_v29 = vmul.f32 0.01, %v1018_v28 }
 0x1f6   : > { %v1049_v30 = vsel %vm1033_vm12, %v1018_v28, %v1041_v29 }
 0x1f7   : > { %v1057_v14 = vadd.f32 %v1049_v30, %v1638_v18 }
 0x1f9   : > { %1065 = vst.msk [vmem:[%s1605_s21 + $0x18] sm:$0xff] %vm415_vm1, %v1057_v14 }
 0x200   : > { %v1020_v33 = vpop.f32.mrf.mxu3 }
 0x201   : > { %v1021_v15 = vadd.f32 %v1470_v21, %v1020_v33 }
 0x203   : > { %vm1034_vm13 = vcmp.gt.f32.partialorder %v1021_v15, 0.0  ;;  %v1042_v34 = vmul.f32 0.01, %v1021_v15 }
 0x205   : > { %v1050_v35 = vsel %vm1034_vm13, %v1021_v15, %v1042_v34 }
 0x206   : > { %v1058_v17 = vadd.f32 %v1050_v35, %v1608_v2 }
 0x208   : > { %1066 = vst.msk [vmem:[%s1605_s21 + $0x20] sm:$0xff] %vm415_vm1, %v1058_v17  ;;  %v1022_v36 = vpop.f32.mrf.mxu3 }
 0x209   : > { %v1023_v37 = vadd.f32 %v1470_v21, %v1022_v36 }
 0x20b   : > { %vm1035_vm14 = vcmp.gt.f32.partialorder %v1023_v37, 0.0  ;;  %v1043_v39 = vmul.f32 0.01, %v1023_v37 }
 0x20d   : > { %v1051_v38 = vsel %vm1035_vm14, %v1023_v37, %v1043_v39 }
 0x20e   : > { %v1059_v40 = vadd.f32 %v1051_v38, %v1610_v3 }
 0x210   : > { %1067 = vst.msk [vmem:[%s1605_s21 + $0x28] sm:$0xff] %vm415_vm1, %v1059_v40 }
 0x217   : > { %v1025_v18 = vpop.f32.mrf.mxu3 }
 0x218   : > { %v1026_v41 = vadd.f32 %v1470_v21, %v1025_v18 }
 0x21a   : > { %vm1036_vm15 = vcmp.gt.f32.partialorder %v1026_v41, 0.0  ;;  %v1044_v42 = vmul.f32 0.01, %v1026_v41 }
 0x21c   : > { %v1052_v43 = vsel %vm1036_vm15, %v1026_v41, %v1044_v42 }
 0x21d   : > { %v1060_v2 = vadd.f32 %v1052_v43, %v1619_v8 }
 0x21f   : > { %1068 = vst.msk [vmem:[%s1605_s21 + $0x30] sm:$0xff] %vm415_vm1, %v1060_v2  ;;  %v1027_v44 = vpop.f32.mrf.mxu3 }
 0x220   : > { %v1028_v45 = vadd.f32 %v1470_v21, %v1027_v44 }
 0x222   : > { %vm1037_vm0 = vcmp.gt.f32.partialorder %v1028_v45, 0.0  ;;  %v1045_v46 = vmul.f32 0.01, %v1028_v45 }
 0x223   : > { %v1010_v47 = vpop.f32.mrf.mxu1 }
 0x224   : > { %v1053_v3 = vsel %vm1037_vm0, %v1028_v45, %v1045_v46  ;;  %v1011_v48 = vadd.f32 %v1470_v21, %v1010_v47 }
 0x225   : > { %v1061_v49 = vadd.f32 %v1053_v3, %v1621_v9 }
 0x226   : > { %vm1030_vm3 = vcmp.gt.f32.partialorder %v1011_v48, 0.0  ;;  %v1038_v50 = vmul.f32 0.01, %v1011_v48 }
 0x227   : > { %1069 = vst.msk [vmem:[%s1605_s21 + $0x38] sm:$0xff] %vm415_vm1, %v1061_v49 }
 0x228   : > { %v1046_v51 = vsel %vm1030_vm3, %v1011_v48, %v1038_v50 }
 0x229   : > { %v1054_v52 = vadd.f32 %v1046_v51, %v1625_v11 }
 0x22b   : > { %1062 = vst.msk [vmem:[%s1605_s21] sm:$0xff] %vm415_vm1, %v1054_v52  ;;  %v1012_v8 = vpop.f32.mrf.mxu1 }
 0x22c   : > { %v1013_v53 = vadd.f32 %v1470_v21, %v1012_v8 }
 0x22e   : > { %vm1031_vm4 = vcmp.gt.f32.partialorder %v1013_v53, 0.0  ;;  %v1039_v54 = vmul.f32 0.01, %v1013_v53 }
 0x230   : > { %v1047_v55 = vsel %vm1031_vm4, %v1013_v53, %v1039_v54 }
 0x231   : > { %v1055_v56 = vadd.f32 %v1047_v55, %v1627_v12 }
 0x233   : > { %1063 = vst.msk [vmem:[%s1605_s21 + $0x8] sm:$0xff] %vm415_vm1, %v1055_v56 }
 0x234 PF: > { %s17_s28 = sadd.s32 1, %s1509_s28   ;;  %s1888_s24 = smov %s1501_s26 }
 0x235   : > { %p14_p10 = scmp.ge.s32.totalorder %s17_s28, 10   ;;  %s1889_s25 = smov %s1505_s27 }
 0x236   : > { %s1890_s26 = smov %s1893_s29  ;;  %s1891_s27 = smov %s1897_s30 }
 0x237   :  { %16 = sbr.rel (!%p14_p10) target bundleno = 3 (0x3), region = 95 }

</bundles_post_ra>
